<compile_context>
chip_gen: v6e
topology: v6e:2x2x1
jax: 0.10.0
libtpu: 0.0.40
codegen_flags: <defaults>
</compile_context>

<pallas_src>
import jax
import jax.numpy as jnp
from jax.experimental import pallas as pl
from jax.experimental.pallas import tpu as pltpu

IN_DIM = 784
HID_DIM = 128
OUT_DIM = 10
OUT_PAD = 128  # lane-dense padded output width


def _round_up(x, m):
    return ((x + m - 1) // m) * m


def _mlp_kernel(x_ref, w1_ref, b1_ref, w2_ref, b2_ref, o_ref):
    # In-kernel cast: HBM carries x exactly once (f32); MXU gets bf16.
    x = x_ref[...].astype(jnp.bfloat16)
    # fc1: [TB,784]bf16 @ [784,128]bf16 -> f32 acc, + b1, ReLU
    h = jnp.dot(x, w1_ref[...], preferred_element_type=jnp.float32)
    h = jnp.maximum(h + b1_ref[...], 0.0)
    # fc2: [TB,128]bf16 @ [128,128(pad)]bf16 -> f32 acc, + b2(pad)
    out = jnp.dot(h.astype(jnp.bfloat16), w2_ref[...],
                  preferred_element_type=jnp.float32)
    o_ref[...] = (out + b2_ref[...]).astype(o_ref.dtype)


def prepare_params(w1, b1, w2, b2):
    """One-time parameter prep (hoisted out of the per-call hot path)."""
    w1_bf = w1.astype(jnp.bfloat16)                      # (784, 128)
    b1_2d = b1.reshape(1, HID_DIM).astype(jnp.float32)   # (1, 128)
    w2_pad = jnp.zeros((HID_DIM, OUT_PAD), jnp.bfloat16)
    w2_pad = w2_pad.at[:, :OUT_DIM].set(w2.astype(jnp.bfloat16))
    b2_pad = jnp.zeros((1, OUT_PAD), jnp.float32)
    b2_pad = b2_pad.at[0, :OUT_DIM].set(b2.astype(jnp.float32))
    return w1_bf, b1_2d, w2_pad, b2_pad


def dnn_net_forward(x, w1_bf, b1_2d, w2_pad, b2_pad, *, block_b=2048):
    """Pallas forward pass of DnnNet.

    x: (..., 784) or anything reshapable to (-1, 784), any float dtype.
    Prepared params come from prepare_params(). Returns (B, 10) float32.
    """
    x2d = x.reshape(-1, IN_DIM).astype(jnp.float32)
    B = x2d.shape[0]

    # Batch tile: multiple of 16 (bf16 output packing), capped at block_b and
    # at ~ceil(B/2) so there are >=2 grid steps when B allows (v7x megacore).
    TB = max(16, min(block_b, _round_up(pl.cdiv(B, 2), 16)))
    grid = (pl.cdiv(B, TB),)  # last block may be partial; extra rows ignored

    flops = 2 * B * (IN_DIM * HID_DIM + HID_DIM * OUT_PAD)
    bytes_accessed = (
        B * IN_DIM * 4                 # x (f32, read once)
        + IN_DIM * HID_DIM * 2         # w1 (bf16)
        + HID_DIM * OUT_PAD * 2        # w2 (bf16, padded)
        + (HID_DIM + OUT_PAD) * 4      # biases (f32)
        + B * OUT_PAD * 2              # padded logits (bf16)
    )
    cost = pl.CostEstimate(flops=flops, transcendentals=0,
                           bytes_accessed=bytes_accessed)

    out_pad = pl.pallas_call(
        _mlp_kernel,
        out_shape=jax.ShapeDtypeStruct((B, OUT_PAD), jnp.bfloat16),
        grid=grid,
        in_specs=[
            pl.BlockSpec((TB, IN_DIM), lambda i: (i, 0)),        # x tile (f32)
            pl.BlockSpec((IN_DIM, HID_DIM), lambda i: (0, 0)),   # w1 resident
            pl.BlockSpec((1, HID_DIM), lambda i: (0, 0)),        # b1 resident
            pl.BlockSpec((HID_DIM, OUT_PAD), lambda i: (0, 0)),  # w2 resident
            pl.BlockSpec((1, OUT_PAD), lambda i: (0, 0)),        # b2 resident
        ],
        out_specs=pl.BlockSpec((TB, OUT_PAD), lambda i: (i, 0)),
        compiler_params=pltpu.CompilerParams(
            dimension_semantics=("parallel",),
            vmem_limit_bytes=48 << 20,
        ),
        cost_estimate=cost,
    )(x2d, w1_bf, b1_2d, w2_pad, b2_pad)

    # Slice off the lane padding; upcast for downstream f32 consumers.
    return out_pad[:, :OUT_DIM].astype(jnp.float32)


def _reference_forward(x, w1, b1, w2, b2):
    # Reference matching the kernel's bf16-in / f32-accumulate / bf16-out numerics.
    x2d = x.reshape(-1, IN_DIM).astype(jnp.bfloat16).astype(jnp.float32)
    w1f = w1.astype(jnp.bfloat16).astype(jnp.float32)
    w2f = w2.astype(jnp.bfloat16).astype(jnp.float32)
    h = jnp.maximum(x2d @ w1f + b1, 0.0)
    h = h.astype(jnp.bfloat16).astype(jnp.float32)
    out = h @ w2f + b2
    return out.astype(jnp.bfloat16).astype(jnp.float32)


if __name__ == "__main__":
    key = jax.random.PRNGKey(0)
    kx, kw1, kb1, kw2, kb2 = jax.random.split(key, 5)

    # MNIST-like input: (batch=8, 1, 28, 28) -> flattened to (8, 784) inside.
    x = jax.random.normal(kx, (8, 1, 28, 28), dtype=jnp.float32)

    # Deterministic nn.Linear-like parameters, stored transposed (in x out).
    w1 = jax.random.uniform(kw1, (IN_DIM, HID_DIM), jnp.float32, -0.035, 0.035)
    b1 = jax.random.uniform(kb1, (HID_DIM,), jnp.float32, -0.035, 0.035)
    w2 = jax.random.uniform(kw2, (HID_DIM, OUT_DIM), jnp.float32, -0.088, 0.088)
    b2 = jax.random.uniform(kb2, (OUT_DIM,), jnp.float32, -0.088, 0.088)

    params = prepare_params(w1, b1, w2, b2)      # one-time prep, off hot path
    fwd = jax.jit(dnn_net_forward)

    out = jax.block_until_ready(fwd(x, *params))

    ref = _reference_forward(x, w1, b1, w2, b2)
    assert out.shape == (8, OUT_DIM), out.shape
    assert jnp.allclose(out, ref, atol=2e-2, rtol=2e-2), "mismatch vs reference"

    print("KERNEL_OK")
</pallas_src>

<mosaic_0001>
module attributes {stable_mosaic.version = 11 : i64} {
  func.func @_mlp_kernel(%arg0: i32, %arg1: memref<16x784xf32, #tpu.memory_space<vmem>>, %arg2: memref<784x128xbf16, #tpu.memory_space<vmem>>, %arg3: memref<1x128xf32, #tpu.memory_space<vmem>>, %arg4: memref<128x128xbf16, #tpu.memory_space<vmem>>, %arg5: memref<1x128xf32, #tpu.memory_space<vmem>>, %arg6: memref<16x128xbf16, #tpu.memory_space<vmem>>) attributes {dimension_semantics = [#tpu.dimension_semantics<parallel>], iteration_bounds = array<i64: 1>, scalar_prefetch = 0 : i64, scratch_operands = 0 : i64, tpu.core_type = #tpu.core_type<tc>, window_params = [{transform_indices = @transform_0, window_bounds = array<i64: 16, 784>}, {pipeline_mode = #tpu.pipeline_mode<synchronous>, transform_indices = @transform_1, window_bounds = array<i64: 784, 128>}, {pipeline_mode = #tpu.pipeline_mode<synchronous>, transform_indices = @transform_2, window_bounds = array<i64: 1, 128>}, {pipeline_mode = #tpu.pipeline_mode<synchronous>, transform_indices = @transform_3, window_bounds = array<i64: 128, 128>}, {pipeline_mode = #tpu.pipeline_mode<synchronous>, transform_indices = @transform_4, window_bounds = array<i64: 1, 128>}, {transform_indices = @transform_5, window_bounds = array<i64: 16, 128>}]} {
    %c0 = arith.constant 0 : index
    %c0_0 = arith.constant 0 : index
    %0 = vector.load %arg1[%c0, %c0_0] : memref<16x784xf32, #tpu.memory_space<vmem>>, vector<16x784xf32>
    %1 = arith.truncf %0 : vector<16x784xf32> to vector<16x784xbf16>
    %c0_1 = arith.constant 0 : index
    %c0_2 = arith.constant 0 : index
    %2 = vector.load %arg2[%c0_1, %c0_2] : memref<784x128xbf16, #tpu.memory_space<vmem>>, vector<784x128xbf16>
    %cst = arith.constant dense<0.000000e+00> : vector<16x128xf32>
    %3 = tpu.matmul %1, %2, %cst {dimension_numbers = #tpu.dot_dimension_numbers<[1], [0], [0], [1], [0, 0, 1, 1], [], []>} : vector<16x784xbf16>, vector<784x128xbf16>, vector<16x128xf32> -> vector<16x128xf32>
    %c0_3 = arith.constant 0 : index
    %c0_4 = arith.constant 0 : index
    %4 = vector.load %arg3[%c0_3, %c0_4] : memref<1x128xf32, #tpu.memory_space<vmem>>, vector<1x128xf32>
    %5 = vector.broadcast %4 : vector<1x128xf32> to vector<16x128xf32>
    %6 = arith.addf %3, %5 : vector<16x128xf32>
    %cst_5 = arith.constant 0.000000e+00 : f32
    %7 = vector.broadcast %cst_5 : f32 to vector<16x128xf32>
    %8 = arith.maximumf %6, %7 : vector<16x128xf32>
    %9 = arith.truncf %8 : vector<16x128xf32> to vector<16x128xbf16>
    %c0_6 = arith.constant 0 : index
    %c0_7 = arith.constant 0 : index
    %10 = vector.load %arg4[%c0_6, %c0_7] : memref<128x128xbf16, #tpu.memory_space<vmem>>, vector<128x128xbf16>
    %cst_8 = arith.constant dense<0.000000e+00> : vector<16x128xf32>
    %11 = tpu.matmul %9, %10, %cst_8 {dimension_numbers = #tpu.dot_dimension_numbers<[1], [0], [0], [1], [0, 0, 1, 1], [], []>} : vector<16x128xbf16>, vector<128x128xbf16>, vector<16x128xf32> -> vector<16x128xf32>
    %c0_9 = arith.constant 0 : index
    %c0_10 = arith.constant 0 : index
    %12 = vector.load %arg5[%c0_9, %c0_10] : memref<1x128xf32, #tpu.memory_space<vmem>>, vector<1x128xf32>
    %13 = vector.broadcast %12 : vector<1x128xf32> to vector<16x128xf32>
    %14 = arith.addf %11, %13 : vector<16x128xf32>
    %15 = arith.truncf %14 : vector<16x128xf32> to vector<16x128xbf16>
    %c0_11 = arith.constant 0 : index
    %c0_12 = arith.constant 0 : index
    %16 = vector.load %arg6[%c0_11, %c0_12] : memref<16x128xbf16, #tpu.memory_space<vmem>>, vector<16x128xbf16>
    tpu.vector_store %arg6[%c0_11, %c0_12], %15 {strides = array<i32>} : memref<16x128xbf16, #tpu.memory_space<vmem>>, vector<16x128xbf16>,
    return
  }
  func.func @transform_0(%arg0: i32) -> (i32, i32) {
    %c0_i32 = arith.constant 0 : i32
    %c0_i32_0 = arith.constant 0 : i32
    return %arg0, %c0_i32 : i32, i32
  }
  func.func @transform_1(%arg0: i32) -> (i32, i32) {
    %c0_i32 = arith.constant 0 : i32
    %c0_i32_0 = arith.constant 0 : i32
    %c0_i32_1 = arith.constant 0 : i32
    return %c0_i32, %c0_i32_0 : i32, i32
  }
  func.func @transform_2(%arg0: i32) -> (i32, i32) {
    %c0_i32 = arith.constant 0 : i32
    %c0_i32_0 = arith.constant 0 : i32
    %c0_i32_1 = arith.constant 0 : i32
    return %c0_i32, %c0_i32_0 : i32, i32
  }
  func.func @transform_3(%arg0: i32) -> (i32, i32) {
    %c0_i32 = arith.constant 0 : i32
    %c0_i32_0 = arith.constant 0 : i32
    %c0_i32_1 = arith.constant 0 : i32
    return %c0_i32, %c0_i32_0 : i32, i32
  }
  func.func @transform_4(%arg0: i32) -> (i32, i32) {
    %c0_i32 = arith.constant 0 : i32
    %c0_i32_0 = arith.constant 0 : i32
    %c0_i32_1 = arith.constant 0 : i32
    return %c0_i32, %c0_i32_0 : i32, i32
  }
  func.func @transform_5(%arg0: i32) -> (i32, i32) {
    %c0_i32 = arith.constant 0 : i32
    %c0_i32_0 = arith.constant 0 : i32
    return %arg0, %c0_i32 : i32, i32
  }
}

</mosaic_0001>

<bundles_post_ra>
// kernel: dnn_net_forward.1
= control target key start
LH: loop header
LB: loop body
LE: loop exit
PB: predicated region body
PF: predicated region fallthrough
CT: control target
= control target key end

     0   :  { %v1006_v43 = vmov 0.0   ;;  %vm1007_vm0 = vmmov 0   ;;  %vm441_vm1 = vcmask 130048   ;;  %s1273_s0 = inlined_call_operand.vmem [shape: f32[8,784], index: 0, kind: input, shape index: {}]   ;;  %s1274_s1 = inlined_call_operand.vmem [shape: bf16[784,128], index: 1, kind: input, shape index: {}]   ;;  %s1275_s2 = inlined_call_operand.vmem [shape: f32[1,128], index: 2, kind: input, shape index: {}]   ;;  %s1276_s3 = inlined_call_operand.vmem [shape: bf16[128,128], index: 3, kind: input, shape index: {}]   ;;  %s1277_s4 = inlined_call_operand.vmem [shape: f32[1,128], index: 4, kind: input, shape index: {}]   ;;  %s1278_s5 = inlined_call_operand.vmem [shape: bf16[8,128], index: 5, kind: output, shape index: {}]  }
   0x1   :  { %v949_v0 = vld [vmem:[%s1274_s1 + $0x78] sm:$0xff]   ;;  %v953_v4 = vld [vmem:[%s1274_s1 + $0x70] sm:$0xff]   ;;  %v957_v8 = vld [vmem:[%s1274_s1 + $0x68] sm:$0xff]  }
   0x2   :  { %v950_v1 = vld [vmem:[%s1274_s1 + $0x38] sm:$0xff]   ;;  %844 = vmatprep.subr.bf16.mxu0 %v949_v0  ;;  %v954_v5 = vld [vmem:[%s1274_s1 + $0x30] sm:$0xff]   ;;  %v958_v9 = vld [vmem:[%s1274_s1 + $0x28] sm:$0xff]  }
   0x3   :  { %v951_v2 = vld [vmem:[%s1274_s1 + $0xf8] sm:$0xff]   ;;  %845 = vmatpush3.bf16.msra.mxu0 %v950_v1  ;;  %v955_v6 = vld [vmem:[%s1274_s1 + $0xf0] sm:$0xff]   ;;  %v959_v10 = vld [vmem:[%s1274_s1 + $0xe8] sm:$0xff]  }
   0x4   :  { %v952_v3 = vld [vmem:[%s1274_s1 + $0xb8] sm:$0xff]   ;;  %866 = vmatprep.subr.bf16.mxu1 %v951_v2  ;;  %846 = vmatprep.subr.bf16.mxu0 %v953_v4  ;;  %v956_v7 = vld [vmem:[%s1274_s1 + $0xb0] sm:$0xff]   ;;  %v960_v11 = vld [vmem:[%s1274_s1 + $0xa8] sm:$0xff]  }
   0x5   :  { %867 = vmatpush3.bf16.msra.mxu1 %v952_v3  ;;  %v961_v12 = vld [vmem:[%s1274_s1 + $0x60] sm:$0xff]   ;;  %v965_v16 = vld [vmem:[%s1274_s1 + $0x58] sm:$0xff]   ;;  %v969_v20 = vld [vmem:[%s1274_s1 + $0x50] sm:$0xff]  }
   0x6   :  { %868 = vmatprep.subr.bf16.mxu1 %v955_v6  ;;  %v962_v13 = vld [vmem:[%s1274_s1 + $0x20] sm:$0xff]   ;;  %v966_v17 = vld [vmem:[%s1274_s1 + $0x18] sm:$0xff]   ;;  %v970_v21 = vld [vmem:[%s1274_s1 + $0x10] sm:$0xff]  }
   0x7   :  { %847 = vmatpush3.bf16.msra.mxu0 %v954_v5  ;;  %v963_v14 = vld [vmem:[%s1274_s1 + $0xe0] sm:$0xff]   ;;  %v967_v18 = vld [vmem:[%s1274_s1 + $0xd8] sm:$0xff]   ;;  %v971_v22 = vld [vmem:[%s1274_s1 + $0xd0] sm:$0xff]  }
   0x8   :  { %848 = vmatprep.subr.bf16.mxu0 %v957_v8  ;;  %v964_v15 = vld [vmem:[%s1274_s1 + $0xa0] sm:$0xff]   ;;  %v968_v19 = vld [vmem:[%s1274_s1 + $0x98] sm:$0xff]   ;;  %v972_v23 = vld [vmem:[%s1274_s1 + $0x90] sm:$0xff]  }
   0x9   :  { %869 = vmatpush3.bf16.msra.mxu1 %v956_v7  ;;  %v973_v24 = vld [vmem:[%s1274_s1 + $0x48] sm:$0xff]   ;;  %v977_v28 = vld [vmem:[%s1274_s1 + $0x40] sm:$0xff]   ;;  %v28_v36 = vld [vmem:[%s1273_s0 + $0x38] sm:$0xff] }
   0xa   :  { %870 = vmatprep.subr.bf16.mxu1 %v959_v10  ;;  %v974_v25 = vld [vmem:[%s1274_s1 + $0x8] sm:$0xff]   ;;  %v978_v29 = vld [vmem:[%s1274_s1] sm:$0xff]   ;;  %v981_v38 = vld [vmem:[%s1274_s1 + $0x178] sm:$0xff]  }
   0xb   :  { %849 = vmatpush3.bf16.msra.mxu0 %v958_v9  ;;  %v975_v26 = vld [vmem:[%s1274_s1 + $0xc8] sm:$0xff]   ;;  %v979_v30 = vld [vmem:[%s1274_s1 + $0xc0] sm:$0xff]   ;;  %v24_v39 = vld [vmem:[%s1273_s0 + $0x18] sm:$0xff] }
   0xc   :  { %850 = vmatprep.subr.bf16.mxu0 %v961_v12  ;;  %v976_v27 = vld [vmem:[%s1274_s1 + $0x88] sm:$0xff]   ;;  %v29_v32 = vld [vmem:[%s1273_s0 + $0x40] sm:$0xff]  ;;  %v31_v40 = vld [vmem:[%s1273_s0 + $0x50] sm:$0xff] }
   0xd   :  { %871 = vmatpush3.bf16.msra.mxu1 %v960_v11  ;;  %v22_v31 = vld [vmem:[%s1273_s0 + $0x8] sm:$0xff]  ;;  %v980_v34 = vld [vmem:[%s1274_s1 + $0x80] sm:$0xff]   ;;  %v38_v41 = vpack.c.bf16 %v31_v40, %v24_v39  ;;  %v982_v42 = vld [vmem:[%s1274_s1 + $0x138] sm:$0xff]  }
   0xe   :  { %872 = vmatprep.subr.bf16.mxu1 %v963_v14  ;;  %v36_v33 = vpack.c.bf16 %v29_v32, %v22_v31  ;;  %v21_v35 = vld [vmem:[%s1273_s0] sm:$0xff]  ;;  %v23_v44 = vld [vmem:[%s1273_s0 + $0x10] sm:$0xff]  ;;  %v30_v45 = vld [vmem:[%s1273_s0 + $0x48] sm:$0xff] }
   0xf   :  { %851 = vmatpush3.bf16.msra.mxu0 %v962_v13  ;;  %v35_v37 = vpack.c.bf16 %v28_v36, %v21_v35  ;;  %518 = vmatprep.mubr.bf16.mxu1 %v38_v41  ;;  %v37_v46 = vpack.c.bf16 %v30_v45, %v23_v44  ;;  %v983_v47 = vld [vmem:[%s1274_s1 + $0x170] sm:$0xff]   ;;  %v985_v49 = vld [vmem:[%s1274_s1 + $0x168] sm:$0xff]   ;;  %v987_v51 = vld [vmem:[%s1274_s1 + $0x160] sm:$0xff]  }
  0x10   :  { %852 = vmatprep.subr.bf16.mxu0 %v965_v16  ;;  %477 = vmatprep.mubr.bf16.mxu0 %v36_v33  ;;  %v984_v48 = vld [vmem:[%s1274_s1 + $0x130] sm:$0xff]   ;;  %v986_v50 = vld [vmem:[%s1274_s1 + $0x128] sm:$0xff]   ;;  %v988_v52 = vld [vmem:[%s1274_s1 + $0x120] sm:$0xff]  }
  0x11   :  { %873 = vmatpush3.bf16.msra.mxu1 %v964_v15  ;;  %v989_v53 = vld [vmem:[%s1274_s1 + $0x158] sm:$0xff]   ;;  %v991_v55 = vld [vmem:[%s1274_s1 + $0x150] sm:$0xff]   ;;  %v997_v56 = vld [vmem:[%s1274_s1 + $0x180] sm:$0xff]  }
  0x12   :  { %874 = vmatprep.subr.bf16.mxu1 %v967_v18  ;;  %v990_v54 = vld [vmem:[%s1274_s1 + $0x118] sm:$0xff]   ;;  %v26_v57 = vld [vmem:[%s1273_s0 + $0x28] sm:$0xff]  ;;  %v992_v58 = vld [vmem:[%s1274_s1 + $0x110] sm:$0xff]  }
  0x13   :  { %853 = vmatpush3.bf16.msra.mxu0 %v966_v17  ;;  %v993_v59 = vld [vmem:[%s1274_s1 + $0x148] sm:$0xff]   ;;  %v33_v60 = vld [vmem:[%s1273_s0 + $0x60] sm:$0xff]  ;;  %v27_v62 = vld [vmem:[%s1273_s0 + $0x30] sm:$0xff] }
  0x14   :  { %854 = vmatprep.subr.bf16.mxu0 %v969_v20  ;;  %v40_v61 = vpack.c.bf16 %v33_v60, %v26_v57  ;;  %v34_v63 = vld [vmem:[%s1273_s0 + $0x68] sm:$0xff]  ;;  %v995_v2 = vld [vmem:[%s1274_s1 + $0x140] sm:$0xff]   ;;  %v32_v5 = vld [vmem:[%s1273_s0 + $0x58] sm:$0xff] }
  0x15   :  { %875 = vmatpush3.bf16.msra.mxu1 %v968_v19  ;;  %v41_v0 = vpack.c.bf16 %v34_v63, %v27_v62  ;;  %v994_v1 = vld [vmem:[%s1274_s1 + $0x108] sm:$0xff]   ;;  %v996_v3 = vld [vmem:[%s1274_s1 + $0x100] sm:$0xff]   ;;  %v998_v7 = vld [vmem:[%s1276_s3 + $0x38] sm:$0xff]  }
  0x16   :  { %876 = vmatprep.subr.bf16.mxu1 %v971_v22  ;;  %v25_v4 = vld [vmem:[%s1273_s0 + $0x20] sm:$0xff]  ;;  %v999_v8 = vld [vmem:[%s1276_s3 + $0x30] sm:$0xff]   ;;  %v1000_v9 = vld [vmem:[%s1276_s3 + $0x28] sm:$0xff]  }
  0x17   :  { %855 = vmatpush3.bf16.msra.mxu0 %v970_v21  ;;  %v39_v6 = vpack.c.bf16 %v32_v5, %v25_v4  ;;  %v1001_v10 = vld [vmem:[%s1276_s3 + $0x20] sm:$0xff]   ;;  %v1002_v11 = vld [vmem:[%s1276_s3 + $0x18] sm:$0xff]   ;;  %v1003_v12 = vld [vmem:[%s1276_s3 + $0x10] sm:$0xff]  }
  0x18   :  { %856 = vmatprep.subr.bf16.mxu0 %v973_v24  ;;  %v1004_v13 = vld [vmem:[%s1276_s3 + $0x8] sm:$0xff]   ;;  %v1005_v14 = vld [vmem:[%s1276_s3] sm:$0xff]  }
  0x19   :  { %877 = vmatpush3.bf16.msra.mxu1 %v972_v23 }
  0x1a   :  { %878 = vmatprep.subr.bf16.mxu1 %v975_v26 }
  0x1b   :  { %857 = vmatpush3.bf16.msra.mxu0 %v974_v25 }
  0x1c   :  { %858 = vmatprep.subr.bf16.mxu0 %v977_v28 }
  0x1d   :  { %879 = vmatpush3.bf16.msra.mxu1 %v976_v27  ;;  %v775_v27 = vld [vmem:[%s1275_s2] ss:$0 sm:$0xff] }
  0x1e   :  { %880 = vmatprep.subr.bf16.mxu1 %v979_v30 }
  0x1f   :  { %859 = vmatpush3.bf16.msra.mxu0 %v978_v29 }
  0x20   :  { %888 = vmatprep.subr.bf16.mxu0 %v981_v38 }
  0x21   :  { %881 = vmatpush3.bf16.msra.mxu1 %v980_v34 }
  0x22   :  { %921 = vmatprep.subr.bf16.mxu1 %v1006_v43  ;;  %478 = vmatmul.mubr.bf16.vlgmr.msra.gmra.mxu0 %v35_v37 }
  0x23   :  { %889 = vmatpush3.bf16.msra.mxu0 %v982_v42  ;;  %559 = vmatprep.mubr.bf16.mxu0 %v40_v61 }
  0x24   :  { %519 = vmatmul.mubr.bf16.vlgmr.msra.gmra.mxu1 %v37_v46  ;;  %890 = vmatprep.subr.bf16.mxu0 %v983_v47 }
  0x25   :  { %923 = vmatprep.mubr.msk.bf16.mxu1 %vm1007_vm0, %v1006_v43  ;;  %922 = vmatpush3.bf16.msra.mxu1 %v997_v56 }
  0x26   :  { %927 = vmatprep.subr.bf16.mxu1 %v1006_v43 }
  0x27   :  { %891 = vmatpush3.bf16.msra.mxu0 %v984_v48 }
  0x28   :  { %892 = vmatprep.subr.bf16.mxu0 %v985_v49 }
  0x2b   :  { %893 = vmatpush3.bf16.msra.mxu0 %v986_v50  ;;  %v826_v50 = vld [vmem:[%s1277_s4] ss:$0 sm:$0xff] }
  0x2c   :  { %894 = vmatprep.subr.bf16.mxu0 %v987_v51  ;;  %924 = vmatmul.mubr.msk.bf16.vlgmr.msra.gmra.mxu1 %vm441_vm1, %v41_v0 }
  0x2d   :  { %943 = vmatprep.mubr.msk.bf16.mxu1 %vm1007_vm0, %v1006_v43  ;;  %928 = vmatpush3.bf16.msra.mxu1 %v998_v7 }
  0x2e   :  { %929 = vmatprep.subr.bf16.mxu1 %v1006_v43 }
  0x2f   :  { %895 = vmatpush3.bf16.msra.mxu0 %v988_v52 }
  0x30   :  { %896 = vmatprep.subr.bf16.mxu0 %v989_v53 }
  0x31   :  { %930 = vmatpush3.bf16.msra.mxu1 %v999_v8 }
  0x32   :  { %931 = vmatprep.subr.bf16.mxu1 %v1006_v43 }
  0x33   :  { %897 = vmatpush3.bf16.msra.mxu0 %v990_v54 }
  0x34   :  { %898 = vmatprep.subr.bf16.mxu0 %v991_v55 }
  0x35   :  { %932 = vmatpush3.bf16.msra.mxu1 %v1000_v9 }
  0x36   :  { %933 = vmatprep.subr.bf16.mxu1 %v1006_v43 }
  0x37   :  { %899 = vmatpush3.bf16.msra.mxu0 %v992_v58 }
  0x38   :  { %900 = vmatprep.subr.bf16.mxu0 %v993_v59 }
  0x39   :  { %934 = vmatpush3.bf16.msra.mxu1 %v1001_v10 }
  0x3a   :  { %935 = vmatprep.subr.bf16.mxu1 %v1006_v43 }
  0x3b   :  { %901 = vmatpush3.bf16.msra.mxu0 %v994_v1 }
  0x3c   :  { %902 = vmatprep.subr.bf16.mxu0 %v995_v2 }
  0x3d   :  { %936 = vmatpush3.bf16.msra.mxu1 %v1002_v11 }
  0x3e   :  { %937 = vmatprep.subr.bf16.mxu1 %v1006_v43 }
  0x3f   :  { %903 = vmatpush3.bf16.msra.mxu0 %v996_v3 }
  0x41   :  { %938 = vmatpush3.bf16.msra.mxu1 %v1003_v12 }
  0x42   :  { %560 = vmatmul.mubr.bf16.vlgmr.msra.gmra.mxu0 %v39_v6  ;;  %939 = vmatprep.subr.bf16.mxu1 %v1006_v43 }
  0x45   :  { %940 = vmatpush3.bf16.msra.mxu1 %v1004_v13 }
  0x46   :  { %941 = vmatprep.subr.bf16.mxu1 %v1006_v43 }
  0x49   :  { %942 = vmatpush3.bf16.msra.mxu1 %v1005_v14 }
  0xe2   :  { %v860_v18 = vpop.f32.mrf.mxu0 }
  0xe4   :  { %v882_v15 = vpop.f32.mrf.mxu1  ;;  %v861_v20 = vpop.f32.mrf.mxu0 }
  0xe5   :  { %v862_v26 = vadd.f32 %v861_v20, %v860_v18 }
  0xe6   :  { %v883_v16 = vpop.f32.mrf.mxu1  ;;  %v863_v23 = vpop.f32.mrf.mxu0 }
  0xe7   :  { %v480_v29 = vadd.f32 %v862_v26, %v775_v27  ;;  %v884_v30 = vadd.f32 %v883_v16, %v882_v15 }
  0xe8   :  { %v885_v17 = vpop.f32.mrf.mxu1  ;;  %v864_v28 = vpop.f32.mrf.mxu0 }
  0xe9   :  { %v865_v31 = vadd.f32 %v864_v28, %v863_v23  ;;  %v521_v34 = vadd.f32 %v884_v30, %v480_v29 }
  0xea   :  { %v886_v19 = vpop.f32.mrf.mxu1 }
  0xeb   :  { %v483_v35 = vadd.f32 %v865_v31, %v775_v27  ;;  %v887_v36 = vadd.f32 %v886_v19, %v885_v17 }
  0xec   :  { %v602_v21 = vpop.f32.mrf.mxu1 }
  0xed   :  { %v524_v41 = vadd.f32 %v887_v36, %v483_v35 }
  0xee   :  { %v925_v22 = vpop.f32.mrf.mxu1 }
  0xf0   :  { %v605_v24 = vpop.f32.mrf.mxu1 }
  0xf2   :  { %v926_v25 = vpop.f32.mrf.mxu1 }
 0x102   :  { %v904_v32 = vpop.f32.mrf.mxu0 }
 0x104   :  { %v905_v33 = vpop.f32.mrf.mxu0 }
 0x105   :  { %v906_v37 = vadd.f32 %v905_v33, %v904_v32 }
 0x106   :  { %v907_v38 = vpop.f32.mrf.mxu0 }
 0x107   :  { %v562_v39 = vadd.f32 %v906_v37, %v521_v34 }
 0x108   :  { %v908_v40 = vpop.f32.mrf.mxu0 }
 0x109   :  { %v909_v42 = vadd.f32 %v908_v40, %v907_v38  ;;  %v603_v43 = vadd.f32 %v602_v21, %v562_v39 }
 0x10b   :  { %v565_v44 = vadd.f32 %v909_v42, %v524_v41  ;;  %v609_v46 = vmax.f32 %v603_v43, 0.0 }
 0x10d   :  { %v606_v45 = vadd.f32 %v605_v24, %v565_v44 }
 0x10f   :  { %v610_v47 = vmax.f32 %v606_v45, 0.0 }
 0x111   :  { %v611_v48 = vpack.c.bf16 %v610_v47, %v609_v46 }
 0x113   :  { %944 = vmatmul.mubr.bf16.vlgmr.msra.gmra.mxu1 %v611_v48 }
 0x1d3   :  { %v717_v49 = vpop.f32.mrf.mxu1 }
 0x1d4   :  { %v718_v53 = vadd.f32 %v826_v50, %v717_v49 }
 0x1d5   :  { %v945_v51 = vpop.f32.mrf.mxu1 }
 0x1d7   :  { %v720_v52 = vpop.f32.mrf.mxu1 }
 0x1d8   :  { %v721_v54 = vadd.f32 %v826_v50, %v720_v52 }
 0x1d9   :  { %v946_v55 = vpop.f32.mrf.mxu1 }
 0x1da   :  { %v842_v56 = vpack.c.bf16 %v721_v54, %v718_v53 }
 0x1dc   :  { %843 = vst [vmem:[#allocation2] sm:$0xff] %v842_v56  }
 0x1e3   :  { %v752_v57 = vld [vmem:[#allocation2] sm:$0xf] }
 0x1e4   :  { %753 = vst [vmem:[%s1278_s5] sm:$0xf] %v752_v57 }

</bundles_post_ra>
